<compile_context>
chip_gen: v6e
topology: v6e:2x2x1
jax: 0.10.0
libtpu: 0.0.40
codegen_flags: <defaults>
</compile_context>

<pallas_src>
import jax
import jax.numpy as jnp
from jax.experimental import pallas as pl
from jax.experimental.pallas import tpu as pltpu

LANE = 128            # TPU lane width: last-dim padding target
SUBLANE = 8           # f32 sublane granularity
DEFAULT_TILE_B = 2048


def _round_up(n, m):
    return ((n + m - 1) // m) * m


def mlp_kernel(x_ref, w1_ref, b1_ref, w2_ref, b2_ref, w3_ref, b3_ref, o_ref):
    # One batch tile per grid step; weights/biases are VMEM-resident full refs.
    x = x_ref[...]                                            # (TB, in_f) f32

    # fc1 + ReLU   -> (TB, h1_pad), lane-dense
    h1 = jnp.dot(x, w1_ref[...],
                 preferred_element_type=jnp.float32,
                 precision=jax.lax.Precision.HIGHEST) + b1_ref[...]
    h1 = jnp.maximum(h1, 0.0)

    # fc2 + ReLU   -> (TB, h2_pad), lane-dense
    h2 = jnp.dot(h1, w2_ref[...],
                 preferred_element_type=jnp.float32,
                 precision=jax.lax.Precision.HIGHEST) + b2_ref[...]
    h2 = jnp.maximum(h2, 0.0)

    # out (no activation) -> (TB, out_pad), unmasked lane-dense store
    o_ref[...] = (jnp.dot(h2, w3_ref[...],
                          preferred_element_type=jnp.float32,
                          precision=jax.lax.Precision.HIGHEST)
                  + b3_ref[...]).astype(o_ref.dtype)


def prepare_params(params):
    """One-time prep: transpose PyTorch (out,in) weights to (in,out) and
    zero-pad every layer's output dim up to a multiple of 128 lanes.
    (Keep 128-lane padding on v6e too: padding hidden dims to 256 would only
    double the next layer's K for zero useful work.)"""
    w1t = params["w1"].T                      # (in,  h1)
    w2t = params["w2"].T                      # (h1,  h2)
    w3t = params["w3"].T                      # (h2, out)
    in_f, h1 = w1t.shape
    _, h2 = w2t.shape
    _, out_f = w3t.shape
    h1p, h2p, outp = (_round_up(d, LANE) for d in (h1, h2, out_f))

    def pad2(a, rows, cols):
        return jnp.pad(a, ((0, rows - a.shape[0]), (0, cols - a.shape[1])))

    return {
        "w1t": pad2(w1t, in_f, h1p),                              # (in,  h1p)
        "b1":  pad2(params["b1"].reshape(1, -1), 1, h1p),         # (1,   h1p)
        "w2t": pad2(w2t, h1p, h2p),                               # (h1p, h2p)
        "b2":  pad2(params["b2"].reshape(1, -1), 1, h2p),         # (1,   h2p)
        "w3t": pad2(w3t, h2p, outp),                              # (h2p, outp)
        "b3":  pad2(params["b3"].reshape(1, -1), 1, outp),        # (1,   outp)
        "out_features": out_f,
    }


def _choose_batch_tiling(B, tile_b):
    """Sublane-aligned batch tile size.  Pads B by at most 8*num_tiles rows.
    Ensures >= 2 (even) grid steps when there is enough work so that v7x's two
    TensorCores both get batch tiles via the 'parallel' dimension semantics."""
    b8 = _round_up(max(B, 1), SUBLANE)
    num_tiles = pl.cdiv(b8, tile_b)
    if b8 >= 2 * SUBLANE:
        num_tiles = max(num_tiles, 2)
        if num_tiles % 2:                    # even split across 2 TCs
            num_tiles += 1
    tb = _round_up(pl.cdiv(b8, num_tiles), SUBLANE)
    b_pad = tb * num_tiles
    return tb, num_tiles, b_pad


def mlp_forward_padded(x, p, tile_b=DEFAULT_TILE_B):
    """x: (B, input_features) f32.  Returns the lane-dense padded output
    (b_pad, out_pad); rows >= B and columns >= out_features are zero-padding
    artifacts.  Consumers that tolerate padding should use this directly and
    skip the slice pass in mlp_forward()."""
    B, in_f = x.shape
    w1t, b1 = p["w1t"], p["b1"]
    w2t, b2 = p["w2t"], p["b2"]
    w3t, b3 = p["w3t"], p["b3"]
    h1p, h2p, outp = w1t.shape[1], w2t.shape[1], w3t.shape[1]

    tb, num_tiles, b_pad = _choose_batch_tiling(B, tile_b)
    if b_pad != B:
        x = jnp.pad(x, ((0, b_pad - B), (0, 0)))

    grid = (num_tiles,)

    # Weights/biases: fully resident in VMEM, copied in once, no pipelining /
    # double-buffering (their index never changes across the grid).
    resident = pl.BlockSpec(memory_space=pltpu.MemorySpace.VMEM)

    flops = 2 * b_pad * (in_f * h1p + h1p * h2p + h2p * outp)
    bytes_accessed = 4 * (b_pad * in_f + w1t.size + b1.size + w2t.size
                          + b2.size + w3t.size + b3.size + b_pad * outp)

    # Explicit VMEM budget from the actual footprint (resident weights +
    # double-buffered x/out tiles + intermediates) with generous headroom,
    # clamped under every generation's scoped default.
    resident_bytes = 4 * (w1t.size + b1.size + w2t.size + b2.size
                          + w3t.size + b3.size)
    per_step_bytes = 4 * (2 * tb * in_f + 2 * tb * outp
                          + 2 * (tb * h1p + tb * h2p))
    vmem_limit = int(min(64 << 20,
                         max(16 << 20, 2 * (resident_bytes + per_step_bytes))))

    out = pl.pallas_call(
        mlp_kernel,
        out_shape=jax.ShapeDtypeStruct((b_pad, outp), x.dtype),
        grid=grid,
        in_specs=[pl.BlockSpec((tb, in_f), lambda i: (i, 0)),   # batch-tiled x
                  resident, resident,                            # w1t, b1
                  resident, resident,                            # w2t, b2
                  resident, resident],                           # w3t, b3
        out_specs=pl.BlockSpec((tb, outp), lambda i: (i, 0)),    # lane-dense out
        compiler_params=pltpu.CompilerParams(
            dimension_semantics=("parallel",),
            vmem_limit_bytes=vmem_limit),
        cost_estimate=pl.CostEstimate(flops=flops, transcendentals=0,
                                      bytes_accessed=bytes_accessed),
    )(x, w1t, b1, w2t, b2, w3t, b3)
    return out


def mlp_forward(x, p, tile_b=DEFAULT_TILE_B):
    """Exact-shape forward: (B, input_features) -> (B, out_features)."""
    out = mlp_forward_padded(x, p, tile_b)
    return out[:x.shape[0], :p["out_features"]]


def init_params(key, input_features=4, h1=8, h2=9, out_features=3):
    """Deterministic init mimicking nn.Linear's uniform(-1/sqrt(fan_in), 1/sqrt(fan_in))."""
    ks = jax.random.split(key, 6)

    def lin(kw, kb, fan_in, fan_out):
        bound = 1.0 / jnp.sqrt(fan_in)
        w = jax.random.uniform(kw, (fan_out, fan_in), jnp.float32, -bound, bound)
        b = jax.random.uniform(kb, (fan_out,), jnp.float32, -bound, bound)
        return w, b

    w1, b1 = lin(ks[0], ks[1], input_features, h1)
    w2, b2 = lin(ks[2], ks[3], h1, h2)
    w3, b3 = lin(ks[4], ks[5], h2, out_features)
    return {"w1": w1, "b1": b1, "w2": w2, "b2": b2, "w3": w3, "b3": b3}


def reference_forward(x, p):
    h1 = jnp.maximum(x @ p["w1"].T + p["b1"], 0.0)
    h2 = jnp.maximum(h1 @ p["w2"].T + p["b2"], 0.0)
    return h2 @ p["w3"].T + p["b3"]


if __name__ == "__main__":
    key = jax.random.PRNGKey(0)
    k_params, k_x = jax.random.split(key)

    batch = 8
    input_features, h1, h2, out_features = 4, 8, 9, 3

    params = init_params(k_params, input_features, h1, h2, out_features)
    prepped = prepare_params(params)          # one-time transpose + zero-pad
    x = jax.random.normal(k_x, (batch, input_features), jnp.float32)

    out = mlp_forward(x, prepped)
    out = jax.block_until_ready(out)

    ref = reference_forward(x, params)
    assert out.shape == (batch, out_features)
    assert jnp.allclose(out, ref, atol=1e-5, rtol=1e-5), "mismatch vs reference"

    print("KERNEL_OK")
</pallas_src>

<mosaic_0001>
module attributes {stable_mosaic.version = 11 : i64} {
  func.func @mlp_kernel(%arg0: i32, %arg1: memref<8x4xf32, #tpu.memory_space<vmem>>, %arg2: memref<4x128xf32, #tpu.memory_space<vmem>>, %arg3: memref<1x128xf32, #tpu.memory_space<vmem>>, %arg4: memref<128x128xf32, #tpu.memory_space<vmem>>, %arg5: memref<1x128xf32, #tpu.memory_space<vmem>>, %arg6: memref<128x128xf32, #tpu.memory_space<vmem>>, %arg7: memref<1x128xf32, #tpu.memory_space<vmem>>, %arg8: memref<8x128xf32, #tpu.memory_space<vmem>>) attributes {dimension_semantics = [#tpu.dimension_semantics<parallel>], iteration_bounds = array<i64: 1>, scalar_prefetch = 0 : i64, scratch_operands = 0 : i64, tpu.core_type = #tpu.core_type<tc>, window_params = [{transform_indices = @transform_0, window_bounds = array<i64: 8, 4>}, {pipeline_mode = #tpu.pipeline_mode<synchronous>, transform_indices = @transform_1, window_bounds = array<i64: 4, 128>}, {pipeline_mode = #tpu.pipeline_mode<synchronous>, transform_indices = @transform_2, window_bounds = array<i64: 1, 128>}, {pipeline_mode = #tpu.pipeline_mode<synchronous>, transform_indices = @transform_3, window_bounds = array<i64: 128, 128>}, {pipeline_mode = #tpu.pipeline_mode<synchronous>, transform_indices = @transform_4, window_bounds = array<i64: 1, 128>}, {pipeline_mode = #tpu.pipeline_mode<synchronous>, transform_indices = @transform_5, window_bounds = array<i64: 128, 128>}, {pipeline_mode = #tpu.pipeline_mode<synchronous>, transform_indices = @transform_6, window_bounds = array<i64: 1, 128>}, {transform_indices = @transform_7, window_bounds = array<i64: 8, 128>}]} {
    %c0 = arith.constant 0 : index
    %c0_0 = arith.constant 0 : index
    %0 = vector.load %arg1[%c0, %c0_0] : memref<8x4xf32, #tpu.memory_space<vmem>>, vector<8x4xf32>
    %c0_1 = arith.constant 0 : index
    %c0_2 = arith.constant 0 : index
    %1 = vector.load %arg2[%c0_1, %c0_2] : memref<4x128xf32, #tpu.memory_space<vmem>>, vector<4x128xf32>
    %cst = arith.constant dense<0.000000e+00> : vector<8x128xf32>
    %2 = tpu.matmul %0, %1, %cst {dimension_numbers = #tpu.dot_dimension_numbers<[1], [0], [0], [1], [0, 0, 1, 1], [], []>, precision = #tpu.contract_precision<fp32>} : vector<8x4xf32>, vector<4x128xf32>, vector<8x128xf32> -> vector<8x128xf32>
    %c0_3 = arith.constant 0 : index
    %c0_4 = arith.constant 0 : index
    %3 = vector.load %arg3[%c0_3, %c0_4] : memref<1x128xf32, #tpu.memory_space<vmem>>, vector<1x128xf32>
    %4 = vector.broadcast %3 : vector<1x128xf32> to vector<8x128xf32>
    %5 = arith.addf %2, %4 : vector<8x128xf32>
    %cst_5 = arith.constant 0.000000e+00 : f32
    %6 = vector.broadcast %cst_5 : f32 to vector<8x128xf32>
    %7 = arith.maximumf %5, %6 : vector<8x128xf32>
    %c0_6 = arith.constant 0 : index
    %c0_7 = arith.constant 0 : index
    %8 = vector.load %arg4[%c0_6, %c0_7] : memref<128x128xf32, #tpu.memory_space<vmem>>, vector<128x128xf32>
    %cst_8 = arith.constant dense<0.000000e+00> : vector<8x128xf32>
    %9 = tpu.matmul %7, %8, %cst_8 {dimension_numbers = #tpu.dot_dimension_numbers<[1], [0], [0], [1], [0, 0, 1, 1], [], []>, precision = #tpu.contract_precision<fp32>} : vector<8x128xf32>, vector<128x128xf32>, vector<8x128xf32> -> vector<8x128xf32>
    %c0_9 = arith.constant 0 : index
    %c0_10 = arith.constant 0 : index
    %10 = vector.load %arg5[%c0_9, %c0_10] : memref<1x128xf32, #tpu.memory_space<vmem>>, vector<1x128xf32>
    %11 = vector.broadcast %10 : vector<1x128xf32> to vector<8x128xf32>
    %12 = arith.addf %9, %11 : vector<8x128xf32>
    %cst_11 = arith.constant 0.000000e+00 : f32
    %13 = vector.broadcast %cst_11 : f32 to vector<8x128xf32>
    %14 = arith.maximumf %12, %13 : vector<8x128xf32>
    %c0_12 = arith.constant 0 : index
    %c0_13 = arith.constant 0 : index
    %15 = vector.load %arg6[%c0_12, %c0_13] : memref<128x128xf32, #tpu.memory_space<vmem>>, vector<128x128xf32>
    %cst_14 = arith.constant dense<0.000000e+00> : vector<8x128xf32>
    %16 = tpu.matmul %14, %15, %cst_14 {dimension_numbers = #tpu.dot_dimension_numbers<[1], [0], [0], [1], [0, 0, 1, 1], [], []>, precision = #tpu.contract_precision<fp32>} : vector<8x128xf32>, vector<128x128xf32>, vector<8x128xf32> -> vector<8x128xf32>
    %c0_15 = arith.constant 0 : index
    %c0_16 = arith.constant 0 : index
    %17 = vector.load %arg7[%c0_15, %c0_16] : memref<1x128xf32, #tpu.memory_space<vmem>>, vector<1x128xf32>
    %18 = vector.broadcast %17 : vector<1x128xf32> to vector<8x128xf32>
    %19 = arith.addf %16, %18 : vector<8x128xf32>
    %c0_17 = arith.constant 0 : index
    %c0_18 = arith.constant 0 : index
    %20 = vector.load %arg8[%c0_17, %c0_18] : memref<8x128xf32, #tpu.memory_space<vmem>>, vector<8x128xf32>
    tpu.vector_store %arg8[%c0_17, %c0_18], %19 {strides = array<i32>} : memref<8x128xf32, #tpu.memory_space<vmem>>, vector<8x128xf32>,
    return
  }
  func.func @transform_0(%arg0: i32) -> (i32, i32) {
    %c0_i32 = arith.constant 0 : i32
    %c0_i32_0 = arith.constant 0 : i32
    return %arg0, %c0_i32 : i32, i32
  }
  func.func @transform_1(%arg0: i32) -> (i32, i32) {
    %c0_i32 = arith.constant 0 : i32
    %c0_i32_0 = arith.constant 0 : i32
    %c0_i32_1 = arith.constant 0 : i32
    return %c0_i32, %c0_i32_0 : i32, i32
  }
  func.func @transform_2(%arg0: i32) -> (i32, i32) {
    %c0_i32 = arith.constant 0 : i32
    %c0_i32_0 = arith.constant 0 : i32
    %c0_i32_1 = arith.constant 0 : i32
    return %c0_i32, %c0_i32_0 : i32, i32
  }
  func.func @transform_3(%arg0: i32) -> (i32, i32) {
    %c0_i32 = arith.constant 0 : i32
    %c0_i32_0 = arith.constant 0 : i32
    %c0_i32_1 = arith.constant 0 : i32
    return %c0_i32, %c0_i32_0 : i32, i32
  }
  func.func @transform_4(%arg0: i32) -> (i32, i32) {
    %c0_i32 = arith.constant 0 : i32
    %c0_i32_0 = arith.constant 0 : i32
    %c0_i32_1 = arith.constant 0 : i32
    return %c0_i32, %c0_i32_0 : i32, i32
  }
  func.func @transform_5(%arg0: i32) -> (i32, i32) {
    %c0_i32 = arith.constant 0 : i32
    %c0_i32_0 = arith.constant 0 : i32
    %c0_i32_1 = arith.constant 0 : i32
    return %c0_i32, %c0_i32_0 : i32, i32
  }
  func.func @transform_6(%arg0: i32) -> (i32, i32) {
    %c0_i32 = arith.constant 0 : i32
    %c0_i32_0 = arith.constant 0 : i32
    %c0_i32_1 = arith.constant 0 : i32
    return %c0_i32, %c0_i32_0 : i32, i32
  }
  func.func @transform_7(%arg0: i32) -> (i32, i32) {
    %c0_i32 = arith.constant 0 : i32
    %c0_i32_0 = arith.constant 0 : i32
    return %arg0, %c0_i32 : i32, i32
  }
}

</mosaic_0001>

<bundles_post_ra>
// kernel: tpu_custom_call.1
= control target key start
LH: loop header
LB: loop body
LE: loop exit
PB: predicated region body
PF: predicated region fallthrough
CT: control target
= control target key end

     0   :  { %12 = vsyncpa [#allocation3], 0  ;;  %s3420_s0 = inlined_call_operand.vmem [shape: f32[8,4], index: 0, kind: input, shape index: {}]   ;;  %s3421_s1 = inlined_call_operand.vmem [shape: f32[4,128], index: 1, kind: input, shape index: {}]   ;;  %s3422_s2 = inlined_call_operand.vmem [shape: f32[1,128], index: 2, kind: input, shape index: {}]   ;;  %s3423_s3 = inlined_call_operand.hbm [shape: f32[128,128], index: 3, kind: input, shape index: {}]   ;;  %s3424_s4 = inlined_call_operand.vmem [shape: f32[1,128], index: 4, kind: input, shape index: {}]   ;;  %s3425_s5 = inlined_call_operand.hbm [shape: f32[128,128], index: 5, kind: input, shape index: {}]   ;;  %s3426_s6 = inlined_call_operand.vmem [shape: f32[1,128], index: 6, kind: input, shape index: {}]   ;;  %s3427_s7 = inlined_call_operand.hbm [shape: f32[8,128], index: 7, kind: output, shape index: {}]  }
   0x1   :  { %13 = vsyncpa [#allocation6], 0 }
   0x2   :  { %14 = vsyncpa [#allocation4], 0  ;;  %s2607_s24 = smov [#allocation2]  }
   0x3   :  { %s26_s25 = sshll.u32 %s2607_s24, 4  ;;  %s27_s25 = int_to_ptr.vmem [resolvable:$true] %s26_s25 }
   0x4   :  { %s2549_s26 = scalar_lea.vmem %s27_s25, 2048  ;;  %p2554_p1 = scmp.lt.s32.totalorder %s27_s25, %s27_s25 }
   0x5   :  { %p2550_p0 = scmp.ne.s32.totalorder %s27_s25, %s2549_s26  ;;  %p2555_p2 = scmp.lt.s32.totalorder %s2549_s26, %s2549_s26 }
   0x7   :  { %p2556_p3 = por %p2555_p2, %p2554_p1 }
   0x9   :  { %p2557_p4 = pnand %p2556_p3, %p2550_p0 }
   0xb   :  { %2560 = shalt.err (!%p2557_p4)
}
   0xc   :  { %s2608_s27 = smov 128   ;;  %s2609_s28 = smov 8  }
   0xd   :  { %32 = dma.hbm_to_vmem [thread:$0]  %s3423_s3, 2048, %s27_s25, [#allocation3], %s2608_s27, %s2608_s27, %s2609_s28  }
   0xe   :  { %s2610_s8 = smov [#allocation5]  }
   0xf   :  { %s40_s9 = sshll.u32 %s2610_s8, 4  ;;  %s41_s9 = int_to_ptr.vmem [resolvable:$true] %s40_s9 }
  0x10   :  { %s2569_s10 = scalar_lea.vmem %s41_s9, 2048  ;;  %p2574_p6 = scmp.lt.s32.totalorder %s41_s9, %s41_s9 }
  0x11   :  { %p2570_p5 = scmp.ne.s32.totalorder %s41_s9, %s2569_s10  ;;  %p2575_p7 = scmp.lt.s32.totalorder %s2569_s10, %s2569_s10 }
  0x13   :  { %p2576_p8 = por %p2575_p7, %p2574_p6 }
  0x15   :  { %p2577_p9 = pnand %p2576_p8, %p2570_p5 }
  0x17   :  { %2580 = shalt.err (!%p2577_p9)
}
  0x18   :  { %46 = dma.hbm_to_vmem [thread:$0]  %s3425_s5, 2048, %s41_s9, [#allocation6], %s2608_s27, %s2608_s27, %s2609_s28  }
  0x19   :  { %2601 = dma.done.wait [#allocation3], 2048  }
  0x1a   :  { %2602 = vsyncadd [#allocation3], 4294965248 }
  0x1b   :  { %2603 = dma.done.wait [#allocation6], 2048  }
  0x1c   :  { %2604 = vsyncadd [#allocation6], 4294965248  ;;  %v2611_v0 = vmov 0.0   ;;  %vm2612_vm0 = vmmov 0   ;;  %vm68_vm1 = vcmask 1043456   ;;  %vm64_vm2 = vcmask 31744  }
  0x1d   :  { %2084 = vmatprep.subr.mxu0 %v2611_v0  ;;  %2086 = vmatprep.mubr.msk.f32.mxu0 %vm2612_vm0, %v2611_v0  ;;  %v56_v1 = vld [vmem:[%s3421_s1] sm:$0xf]  ;;  %v534_v3 = vld [vmem:[#allocation2 + $0x78] sm:$0xff]  ;;  %v533_v6 = vld [vmem:[#allocation2 + $0x70] sm:$0xff]  ;;  %s2613_s17 = smov [#allocation7]  }
  0x1e   :  { %2089 = vmatprep.subr.mxu1 %v2611_v0  ;;  %2091 = vmatprep.mubr.msk.f32.mxu1 %vm2612_vm0, %v2611_v0  ;;  %v55_v2 = vld [vmem:[%s3420_s0] sm:$0xff]  ;;  %v70_v4 = vsel %vm68_vm1, %v56_v1, 0  ;;  %v2674_v9 = vand.u32 4294901760, %v534_v3  ;;  %v532_v10 = vld [vmem:[#allocation2 + $0x68] sm:$0xff]  ;;  %v2677_v13 = vand.u32 4294901760, %v533_v6  ;;  %v530_v19 = vld [vmem:[#allocation2 + $0x58] sm:$0xff] }
  0x1f   :  { %v66_v5 = vsel %vm64_vm2, %v55_v2, 0  ;;  %v103_v7 = vand.u32 4294901760, %v70_v4  ;;  %v531_v14 = vld [vmem:[#allocation2 + $0x60] sm:$0xff]  ;;  %v2683_v18 = vand.u32 4294901760, %v532_v10  ;;  %v2690_v24 = vand.u32 4294901760, %v530_v19  ;;  %v529_v25 = vld [vmem:[#allocation2 + $0x50] sm:$0xff] }
  0x20   :  { %v2672_v8 = vand.u32 4294901760, %v66_v5  ;;  %v2681_v17 = vsub.f32 %v534_v3, %v2674_v9  ;;  %v2686_v22 = vsub.f32 %v533_v6, %v2677_v13  ;;  %v2688_v23 = vand.u32 4294901760, %v531_v14  ;;  %v528_v30 = vld [vmem:[#allocation2 + $0x48] sm:$0xff]  ;;  %v527_v34 = vld [vmem:[#allocation2 + $0x40] sm:$0xff]  ;;  %v526_v63 = vld [vmem:[#allocation2 + $0x38] sm:$0xff]  ;;  %s1855_s18 = sshll.u32 %s2613_s17, 4  ;;  %s1856_s18 = int_to_ptr.vmem [resolvable:$true] %s1855_s18 }
  0x21   :  { %2085 = vmatpush3.msra.mxu0 %v103_v7  ;;  %v180_v12 = vsub.f32 %v70_v4, %v103_v7  ;;  %v2694_v29 = vsub.f32 %v532_v10, %v2683_v18  ;;  %v2700_v33 = vand.u32 4294901760, %v529_v25  ;;  %v2711_v37 = vsub.f32 %v530_v19, %v2690_v24  ;;  %v525_v2 = vld [vmem:[#allocation2 + $0x30] sm:$0xff]  ;;  %v523_v10 = vld [vmem:[#allocation2 + $0x20] sm:$0xff]  ;;  %s2581_s19 = scalar_lea.vmem %s1856_s18, 128  ;;  %p2586_p11 = scmp.lt.s32.totalorder %s1856_s18, %s1856_s18 }
  0x22   :  { %v139_v11 = vsub.f32 %v66_v5, %v2672_v8  ;;  %2094 = vmatprep.subr.mxu0 %v2611_v0  ;;  %v636_v28 = vand.u32 4294901760, %v2681_v17  ;;  %v643_v31 = vand.u32 4294901760, %v2686_v22  ;;  %v2698_v32 = vsub.f32 %v531_v14, %v2688_v23  ;;  %v524_v5 = vld [vmem:[#allocation2 + $0x28] sm:$0xff]  ;;  %p2582_p10 = scmp.ne.s32.totalorder %s1856_s18, %s2581_s19  ;;  %p2587_p12 = scmp.lt.s32.totalorder %s2581_s19, %s2581_s19 }
  0x23   :  { %v181_v16 = vand.u32 4294901760, %v180_v12  ;;  %v650_v36 = vand.u32 4294901760, %v2694_v29  ;;  %v2713_v38 = vand.u32 4294901760, %v528_v30  ;;  %v2723_v41 = vsub.f32 %v529_v25, %v2700_v33 }
  0x24   :  { %v140_v15 = vand.u32 4294901760, %v139_v11  ;;  %v637_v35 = vsub.f32 %v2681_v17, %v636_v28  ;;  %v644_v39 = vsub.f32 %v2686_v22, %v643_v31  ;;  %v657_v40 = vand.u32 4294901760, %v2698_v32  ;;  %p2588_p13 = por %p2587_p12, %p2586_p11 }
  0x25   :  { %v182_v21 = vsub.f32 %v180_v12, %v181_v16  ;;  %v2725_v42 = vand.u32 4294901760, %v527_v34  ;;  %v651_v44 = vsub.f32 %v2694_v29, %v650_v36  ;;  %v664_v45 = vand.u32 4294901760, %v2711_v37 }
  0x26   :  { %v141_v20 = vsub.f32 %v139_v11, %v140_v15  ;;  %v638_v43 = vand.u32 4294901760, %v637_v35  ;;  %v2735_v46 = vsub.f32 %v528_v30, %v2713_v38  ;;  %v645_v47 = vand.u32 4294901760, %v644_v39  ;;  %p2589_p0 = pnand %p2588_p13, %p2582_p10 }
  0x27   :  { %v183_v27 = vand.u32 4294901760, %v182_v21  ;;  %v658_v48 = vsub.f32 %v2698_v32, %v657_v40  ;;  %v671_v49 = vand.u32 4294901760, %v2723_v41  ;;  %v2746_v50 = vsub.f32 %v527_v34, %v2725_v42 }
  0x28   :  { %v142_v26 = vand.u32 4294901760, %v141_v20  ;;  %v652_v51 = vand.u32 4294901760, %v651_v44  ;;  %v665_v52 = vsub.f32 %v2711_v37, %v664_v45  ;;  %v678_v53 = vand.u32 4294901760, %v2735_v46  ;;  %v520_v44 = vld [vmem:[#allocation2 + $0x8] sm:$0xff] }
  0x29   :  { %2090 = vmatpush3.msra.mxu1 %v183_v27  ;;  %v659_v54 = vand.u32 4294901760, %v658_v48  ;;  %v672_v55 = vsub.f32 %v2723_v41, %v671_v49  ;;  %v685_v56 = vand.u32 4294901760, %v2746_v50  ;;  %v2792_v1 = vand.u32 4294901760, %v526_v63  ;;  %v521_v27 = vld [vmem:[#allocation2 + $0x10] sm:$0xff] }
  0x2a   :  { %2087 = vmatmul.mubr.f32.vlgmr.msra.gmra.mxu0 %v142_v26  ;;  %2092 = vmatmul.mubr.f32.vlgmr.msra.gmra.mxu1 %v2672_v8  ;;  %v666_v57 = vand.u32 4294901760, %v665_v52  ;;  %v679_v58 = vsub.f32 %v2735_v46, %v678_v53  ;;  %v2797_v4 = vand.u32 4294901760, %v525_v2  ;;  %v2835_v39 = vand.u32 4294901760, %v521_v27 }
  0x2b   :  { %2095 = vmatpush3.msra.mxu0 %v180_v12  ;;  %2099 = vmatprep.subr.mxu1 %v2611_v0  ;;  %v673_v59 = vand.u32 4294901760, %v672_v55  ;;  %v686_v60 = vsub.f32 %v2746_v50, %v685_v56  ;;  %v2795_v3 = vsub.f32 %v526_v63, %v2792_v1  ;;  %v2848_v52 = vand.u32 4294901760, %v520_v44  ;;  %v519_v55 = vld [vmem:[#allocation2] sm:$0xff] }
  0x2c   :  { %2096 = vmatprep.mubr.msk.f32.mxu0 %vm2612_vm0, %v2611_v0  ;;  %2100 = vmatpush3.msra.mxu1 %v103_v7  ;;  %v680_v61 = vand.u32 4294901760, %v679_v58 }
  0x2d   :  { %2104 = vmatprep.subr.mxu0 %v2611_v0  ;;  %2101 = vmatprep.mubr.msk.f32.mxu1 %vm2612_vm0, %v2611_v0  ;;  %v687_v62 = vand.u32 4294901760, %v686_v60  ;;  %v692_v6 = vand.u32 4294901760, %v2795_v3  ;;  %v2858_v60 = vand.u32 4294901760, %v519_v55 }
  0x2e   :  { %2097 = vmatmul.mubr.f32.vlgmr.msra.gmra.mxu0 %v139_v11  ;;  %2102 = vmatmul.mubr.f32.vlgmr.msra.gmra.mxu1 %v140_v15  ;;  %v2816_v15 = vand.u32 4294901760, %v523_v10 }
  0x2f   :  { %2105 = vmatpush3.msra.mxu0 %v181_v16  ;;  %2109 = vmatprep.subr.mxu1 %v2611_v0  ;;  %v693_v11 = vsub.f32 %v2795_v3, %v692_v6  ;;  %v522_v16 = vld [vmem:[#allocation2 + $0x18] sm:$0xff] }
  0x30   :  { %2106 = vmatprep.mubr.msk.f32.mxu0 %vm2612_vm0, %v2611_v0  ;;  %2110 = vmatpush3.msra.mxu1 %v103_v7  ;;  %v2803_v7 = vsub.f32 %v525_v2, %v2797_v4  ;;  %v2825_v25 = vsub.f32 %v523_v10, %v2816_v15  ;;  %v2828_v26 = vand.u32 4294901760, %v522_v16  ;;  %v2871_v2 = vsub.f32 %v519_v55, %v2858_v60 }
  0x31   :  { %2111 = vmatprep.mubr.msk.f32.mxu1 %vm2612_vm0, %v2611_v0  ;;  %2149 = vmatprep.subr.mxu1 %v2611_v0  ;;  %v694_v19 = vand.u32 4294901760, %v693_v11 }
  0x32   :  { %2107 = vmatmul.mubr.f32.vlgmr.msra.gmra.mxu0 %v2672_v8  ;;  %2112 = vmatmul.mubr.f32.vlgmr.msra.gmra.mxu1 %v2672_v8  ;;  %v2805_v8 = vand.u32 4294901760, %v524_v5  ;;  %v699_v12 = vand.u32 4294901760, %v2803_v7  ;;  %v3432_v35 = vand.u32 4294901760, %v2825_v25 }
  0x33   :  { %2114 = vmatprep.subr.mxu0 %v2611_v0  ;;  %2150 = vmatpush3.msra.mxu1 %v638_v43  ;;  %v2839_v43 = vsub.f32 %v522_v16, %v2828_v26  ;;  %v3428_v16 = vand.u32 4294901760, %v2871_v2 }
  0x34   :  { %2115 = vmatpush3.msra.mxu0 %v2674_v9  ;;  %2151 = vmatprep.subr.mxu1 %v2611_v0  ;;  %v2814_v14 = vsub.f32 %v524_v5, %v2805_v8  ;;  %v700_v20 = vsub.f32 %v2803_v7, %v699_v12  ;;  %v714_v48 = vsub.f32 %v2825_v25, %v3432_v35 }
  0x35   :  { %2116 = vmatprep.subr.mxu0 %v2611_v0  ;;  %2152 = vmatpush3.msra.mxu1 %v645_v47 }
  0x36   :  { %2117 = vmatpush3.msra.mxu0 %v2677_v13  ;;  %2153 = vmatprep.subr.mxu1 %v2611_v0  ;;  %v3433_v21 = vand.u32 4294901760, %v2814_v14  ;;  %v701_v30 = vand.u32 4294901760, %v700_v20  ;;  %v742_v20 = vsub.f32 %v2871_v2, %v3428_v16 }
  0x37   :  { %2118 = vmatprep.subr.mxu0 %v2611_v0  ;;  %2154 = vmatpush3.msra.mxu1 %v652_v51  ;;  %v2846_v51 = vsub.f32 %v521_v27, %v2835_v39 }
  0x38   :  { %2119 = vmatpush3.msra.mxu0 %v2683_v18  ;;  %2155 = vmatprep.subr.mxu1 %v2611_v0  ;;  %v707_v34 = vsub.f32 %v2814_v14, %v3433_v21  ;;  %v743_v27 = vand.u32 4294901760, %v742_v20 }
  0x39   :  { %2120 = vmatprep.subr.mxu0 %v2611_v0  ;;  %2156 = vmatpush3.msra.mxu1 %v659_v54  ;;  %v3431_v54 = vand.u32 4294901760, %v2839_v43  ;;  %v3430_v58 = vand.u32 4294901760, %v2846_v51 }
  0x3a   :  { %2121 = vmatpush3.msra.mxu0 %v2688_v23  ;;  %2157 = vmatprep.subr.mxu1 %v2611_v0  ;;  %v708_v47 = vand.u32 4294901760, %v707_v34 }
  0x3b   :  { %2122 = vmatprep.subr.mxu0 %v2611_v0  ;;  %2158 = vmatpush3.msra.mxu1 %v666_v57  ;;  %v715_v57 = vand.u32 4294901760, %v714_v48 }
  0x3c   :  { %2123 = vmatpush3.msra.mxu0 %v2690_v24  ;;  %2159 = vmatprep.subr.mxu1 %v2611_v0 }
  0x3d   :  { %2124 = vmatprep.subr.mxu0 %v2611_v0  ;;  %2160 = vmatpush3.msra.mxu1 %v673_v59  ;;  %v2856_v59 = vsub.f32 %v520_v44, %v2848_v52 }
  0x3e   :  { %2125 = vmatpush3.msra.mxu0 %v2700_v33  ;;  %2161 = vmatprep.subr.mxu1 %v2611_v0 }
  0x3f   :  { %2126 = vmatprep.subr.mxu0 %v2611_v0  ;;  %2162 = vmatpush3.msra.mxu1 %v680_v61  ;;  %v721_v61 = vsub.f32 %v2839_v43, %v3431_v54  ;;  %v3429_v63 = vand.u32 4294901760, %v2856_v59 }
  0x40   :  { %2127 = vmatpush3.msra.mxu0 %v2713_v38  ;;  %2163 = vmatprep.subr.mxu1 %v2611_v0 }
  0x41   :  { %2128 = vmatprep.subr.mxu0 %v2611_v0  ;;  %2164 = vmatpush3.msra.mxu1 %v687_v62  ;;  %v728_v62 = vsub.f32 %v2846_v51, %v3430_v58  ;;  %v722_v5 = vand.u32 4294901760, %v721_v61  ;;  %v735_v11 = vsub.f32 %v2856_v59, %v3429_v63 }
  0x42   :  { %2129 = vmatpush3.msra.mxu0 %v2725_v42  ;;  %2165 = vmatprep.subr.mxu1 %v2611_v0 }
  0x43   :  { %2130 = vmatprep.subr.mxu0 %v2611_v0  ;;  %2181 = vmatprep.mubr.msk.f32.mxu1 %vm2612_vm0, %v2611_v0  ;;  %v729_v10 = vand.u32 4294901760, %v728_v62 }
  0x44   :  { %2146 = vmatprep.mubr.msk.f32.mxu0 %vm2612_vm0, %v2611_v0  ;;  %2131 = vmatpush3.msra.mxu0 %v2792_v1 }
  0x45   :  { %2132 = vmatprep.subr.mxu0 %v2611_v0  ;;  %2166 = vmatpush3.msra.mxu1 %v694_v19  ;;  %v736_v19 = vand.u32 4294901760, %v735_v11 }
  0x46   :  { %2133 = vmatpush3.msra.mxu0 %v2797_v4  ;;  %2167 = vmatprep.subr.mxu1 %v2611_v0 }
  0x47   :  { %2134 = vmatprep.subr.mxu0 %v2611_v0  ;;  %2168 = vmatpush3.msra.mxu1 %v701_v30  ;;  %v1865_v30 = vld [vmem:[%s3422_s2] ss:$0 sm:$0xff] }
  0x48   :  { %2135 = vmatpush3.msra.mxu0 %v2805_v8  ;;  %2169 = vmatprep.subr.mxu1 %v2611_v0 }
  0x49   :  { %2136 = vmatprep.subr.mxu0 %v2611_v0  ;;  %2170 = vmatpush3.msra.mxu1 %v708_v47 }
  0x4a   :  { %2137 = vmatpush3.msra.mxu0 %v2816_v15  ;;  %2171 = vmatprep.subr.mxu1 %v2611_v0 }
  0x4b   :  { %2138 = vmatprep.subr.mxu0 %v2611_v0  ;;  %2172 = vmatpush3.msra.mxu1 %v715_v57 }
  0x4c   :  { %2139 = vmatpush3.msra.mxu0 %v2828_v26  ;;  %2173 = vmatprep.subr.mxu1 %v2611_v0 }
  0x4d   :  { %2140 = vmatprep.subr.mxu0 %v2611_v0  ;;  %2174 = vmatpush3.msra.mxu1 %v722_v5 }
  0x4e   :  { %2141 = vmatpush3.msra.mxu0 %v2835_v39  ;;  %2175 = vmatprep.subr.mxu1 %v2611_v0 }
  0x4f   :  { %2142 = vmatprep.subr.mxu0 %v2611_v0  ;;  %2176 = vmatpush3.msra.mxu1 %v729_v10 }
  0x50   :  { %2143 = vmatpush3.msra.mxu0 %v2848_v52  ;;  %2177 = vmatprep.subr.mxu1 %v2611_v0 }
  0x51   :  { %2144 = vmatprep.subr.mxu0 %v2611_v0  ;;  %2178 = vmatpush3.msra.mxu1 %v736_v19 }
  0x52   :  { %2145 = vmatpush3.msra.mxu0 %v2858_v60  ;;  %2179 = vmatprep.subr.mxu1 %v2611_v0 }
  0x53   :  { %2184 = vmatprep.subr.mxu0 %v2611_v0  ;;  %2180 = vmatpush3.msra.mxu1 %v743_v27 }
  0x54   :  { %2219 = vmatprep.subr.mxu1 %v2611_v0 }
  0xea   :  { %v144_v34 = vpop.f32.mrf.mxu0  ;;  %v220_v47 = vpop.f32.mrf.mxu1 }
  0xeb   :  { %v145_v44 = vadd.f32 %v1865_v30, %v144_v34 }
  0xec   :  { %v2088_v48 = vpop.f32.mrf.mxu0  ;;  %v2093_v57 = vpop.f32.mrf.mxu1 }
  0xed   :  { %v221_v55 = vadd.f32 %v220_v47, %v145_v44  ;;  %v1191_v57 = vld [vmem:[#allocation5 + $0x38] sm:$0xff] }
  0xee   :  { %v294_v61 = vpop.f32.mrf.mxu0  ;;  %v368_v5 = vpop.f32.mrf.mxu1 }
  0xef   :  { %v295_v62 = vadd.f32 %v294_v61, %v221_v55 }
  0xf0   :  { %v2098_v10 = vpop.f32.mrf.mxu0  ;;  %v2103_v19 = vpop.f32.mrf.mxu1 }
  0xf1   :  { %v369_v11 = vadd.f32 %v368_v5, %v295_v62  ;;  %v3147_v5 = vand.u32 4294901760, %v1191_v57  ;;  %v1190_v10 = vld [vmem:[#allocation5 + $0x30] sm:$0xff] }
  0xf2   :  { %v442_v20 = vpop.f32.mrf.mxu0  ;;  %v514_v16 = vpop.f32.mrf.mxu1 }
  0xf3   :  { %v443_v27 = vadd.f32 %v442_v20, %v369_v11  ;;  %v3153_v19 = vsub.f32 %v1191_v57, %v3147_v5  ;;  %v3155_v20 = vand.u32 4294901760, %v1190_v10 }
  0xf4   :  { %v2108_v63 = vpop.f32.mrf.mxu0  ;;  %v2113_v54 = vpop.f32.mrf.mxu1 }
  0xf5   :  { %v515_v58 = vadd.f32 %v514_v16, %v443_v27  ;;  %v1189_v27 = vld [vmem:[#allocation5 + $0x28] sm:$0xff] }
  0xf7   :  { %v518_v35 = vmax.f32 %v515_v58, 0.0 }
  0xf9   :  { %v2891_v21 = vand.u32 4294901760, %v518_v35 }
  0xfb   :  { %v2894_v30 = vsub.f32 %v518_v35, %v2891_v21  ;;  %2182 = vmatmul.mubr.f32.vlgmr.msra.gmra.mxu1 %v2891_v21 }
  0xfc   :  { %2220 = vmatpush3.msra.mxu1 %v2674_v9  ;;  %2251 = vmatprep.mubr.msk.f32.mxu1 %vm2612_vm0, %v2611_v0 }
  0xfd   :  { %v625_v34 = vand.u32 4294901760, %v2894_v30  ;;  %2221 = vmatprep.subr.mxu1 %v2611_v0 }
  0xfe   :  { %2222 = vmatpush3.msra.mxu1 %v2677_v13 }
  0xff   :  { %v626_v54 = vsub.f32 %v2894_v30, %v625_v34  ;;  %2223 = vmatprep.subr.mxu1 %v2611_v0 }
 0x100   :  { %2224 = vmatpush3.msra.mxu1 %v2683_v18 }
 0x101   :  { %2225 = vmatprep.subr.mxu1 %v2611_v0  ;;  %v627_v35 = vand.u32 4294901760, %v626_v54  ;;  %v3162_v54 = vsub.f32 %v1190_v10, %v3155_v20 }
 0x102   :  { %2226 = vmatpush3.msra.mxu1 %v2688_v23 }
 0x103   :  { %2227 = vmatprep.subr.mxu1 %v2611_v0  ;;  %2147 = vmatmul.mubr.f32.vlgmr.msra.gmra.mxu0 %v627_v35  ;;  %v3164_v35 = vand.u32 4294901760, %v1189_v27 }
 0x104   :  { %2185 = vmatpush3.msra.mxu0 %v2681_v17  ;;  %2228 = vmatpush3.msra.mxu1 %v2690_v24  ;;  %v3440_v17 = vand.u32 4294901760, %v2839_v43 }
 0x105   :  { %2186 = vmatprep.subr.mxu0 %v2611_v0  ;;  %2229 = vmatprep.subr.mxu1 %v2611_v0 }
 0x106   :  { %2187 = vmatpush3.msra.mxu0 %v2686_v22  ;;  %2230 = vmatpush3.msra.mxu1 %v2700_v33  ;;  %v3442_v22 = vand.u32 4294901760, %v2856_v59 }
 0x107   :  { %2188 = vmatprep.subr.mxu0 %v2611_v0  ;;  %2231 = vmatprep.subr.mxu1 %v2611_v0 }
 0x108   :  { %2189 = vmatpush3.msra.mxu0 %v2694_v29  ;;  %2232 = vmatpush3.msra.mxu1 %v2713_v38  ;;  %v1198_v29 = vld [vmem:[#allocation5 + $0x70] sm:$0xff] }
 0x109   :  { %2190 = vmatprep.subr.mxu0 %v2611_v0  ;;  %2233 = vmatprep.subr.mxu1 %v2611_v0 }
 0x10a   :  { %2191 = vmatpush3.msra.mxu0 %v2698_v32  ;;  %2234 = vmatpush3.msra.mxu1 %v2725_v42  ;;  %v3063_v32 = vand.u32 4294901760, %v1198_v29 }
 0x10b   :  { %2192 = vmatprep.subr.mxu0 %v2611_v0  ;;  %2235 = vmatprep.subr.mxu1 %v2611_v0 }
 0x10c   :  { %2193 = vmatpush3.msra.mxu0 %v2711_v37  ;;  %2236 = vmatpush3.msra.mxu1 %v2792_v1  ;;  %v1195_v37 = vld [vmem:[#allocation5 + $0x58] sm:$0xff] }
 0x10d   :  { %2194 = vmatprep.subr.mxu0 %v2611_v0  ;;  %2237 = vmatprep.subr.mxu1 %v2611_v0 }
 0x10e   :  { %2195 = vmatpush3.msra.mxu0 %v2723_v41  ;;  %2238 = vmatpush3.msra.mxu1 %v2797_v4  ;;  %v3070_v41 = vand.u32 4294901760, %v1195_v37 }
 0x10f   :  { %2196 = vmatprep.subr.mxu0 %v2611_v0  ;;  %2239 = vmatprep.subr.mxu1 %v2611_v0 }
 0x110   :  { %2197 = vmatpush3.msra.mxu0 %v2735_v46  ;;  %2240 = vmatpush3.msra.mxu1 %v2805_v8  ;;  %v1192_v46 = vld [vmem:[#allocation5 + $0x40] sm:$0xff] }
 0x111   :  { %2198 = vmatprep.subr.mxu0 %v2611_v0  ;;  %2241 = vmatprep.subr.mxu1 %v2611_v0 }
 0x112   :  { %2199 = vmatpush3.msra.mxu0 %v2746_v50  ;;  %2242 = vmatpush3.msra.mxu1 %v2816_v15  ;;  %v3075_v50 = vsub.f32 %v1198_v29, %v3063_v32 }
 0x113   :  { %2200 = vmatprep.subr.mxu0 %v2611_v0  ;;  %2243 = vmatprep.subr.mxu1 %v2611_v0 }
 0x114   :  { %2201 = vmatpush3.msra.mxu0 %v2795_v3  ;;  %2244 = vmatpush3.msra.mxu1 %v2828_v26 }
 0x115   :  { %2202 = vmatprep.subr.mxu0 %v2611_v0  ;;  %2245 = vmatprep.subr.mxu1 %v2611_v0 }
 0x116   :  { %2203 = vmatpush3.msra.mxu0 %v2803_v7  ;;  %2246 = vmatpush3.msra.mxu1 %v2835_v39 }
 0x117   :  { %2204 = vmatprep.subr.mxu0 %v2611_v0  ;;  %2247 = vmatprep.subr.mxu1 %v2611_v0 }
 0x118   :  { %2205 = vmatpush3.msra.mxu0 %v2814_v14  ;;  %2248 = vmatpush3.msra.mxu1 %v2848_v52 }
 0x119   :  { %2206 = vmatprep.subr.mxu0 %v2611_v0  ;;  %2249 = vmatprep.subr.mxu1 %v2611_v0 }
 0x11a   :  { %2207 = vmatpush3.msra.mxu0 %v2825_v25  ;;  %2250 = vmatpush3.msra.mxu1 %v2858_v60 }
 0x11b   :  { %2208 = vmatprep.subr.mxu0 %v2611_v0  ;;  %2252 = vmatmul.mubr.f32.vlgmr.msra.gmra.mxu1 %v625_v34  ;;  %v1357_v34 = vand.u32 4294901760, %v3153_v19 }
 0x11c   :  { %2289 = vmatprep.subr.mxu1 %v2611_v0  ;;  %2209 = vmatpush3.msra.mxu0 %v2839_v43 }
 0x11d   :  { %2290 = vmatpush3.msra.mxu1 %v2674_v9  ;;  %2210 = vmatprep.subr.mxu0 %v2611_v0  ;;  %v3438_v9 = vand.u32 4294901760, %v2814_v14 }
 0x11e   :  { %2291 = vmatprep.subr.mxu1 %v2611_v0  ;;  %2211 = vmatpush3.msra.mxu0 %v2846_v51 }
 0x11f   :  { %2292 = vmatpush3.msra.mxu1 %v2677_v13  ;;  %2212 = vmatprep.subr.mxu0 %v2611_v0  ;;  %v3439_v13 = vand.u32 4294901760, %v2825_v25 }
 0x120   :  { %2293 = vmatprep.subr.mxu1 %v2611_v0  ;;  %2213 = vmatpush3.msra.mxu0 %v2856_v59 }
 0x121   :  { %2294 = vmatpush3.msra.mxu1 %v2683_v18  ;;  %2214 = vmatprep.subr.mxu0 %v2611_v0  ;;  %v3441_v18 = vand.u32 4294901760, %v2846_v51 }
 0x122   :  { %2295 = vmatprep.subr.mxu1 %v2611_v0  ;;  %2215 = vmatpush3.msra.mxu0 %v2871_v2 }
 0x123   :  { %2216 = vmatprep.mubr.msk.f32.mxu0 %vm2612_vm0, %v2611_v0  ;;  %2296 = vmatpush3.msra.mxu1 %v2688_v23  ;;  %v3443_v23 = vand.u32 4294901760, %v2871_v2 }
 0x124   :  { %2217 = vmatmul.mubr.f32.vlgmr.msra.gmra.mxu0 %v2894_v30  ;;  %2254 = vmatprep.subr.mxu0 %v2611_v0 }
 0x125   :  { %2297 = vmatprep.subr.mxu1 %v2611_v0  ;;  %2255 = vmatpush3.msra.mxu0 %v636_v28 }
 0x126   :  { %2298 = vmatpush3.msra.mxu1 %v2690_v24  ;;  %2256 = vmatprep.subr.mxu0 %v2611_v0  ;;  %v1199_v24 = vld [vmem:[#allocation5 + $0x78] sm:$0xff] }
 0x127   :  { %2299 = vmatprep.subr.mxu1 %v2611_v0  ;;  %2257 = vmatpush3.msra.mxu0 %v643_v31  ;;  %v3058_v28 = vand.u32 4294901760, %v1199_v24 }
 0x128   :  { %2300 = vmatpush3.msra.mxu1 %v2700_v33  ;;  %2258 = vmatprep.subr.mxu0 %v2611_v0  ;;  %v1197_v33 = vld [vmem:[#allocation5 + $0x68] sm:$0xff] }
 0x129   :  { %2301 = vmatprep.subr.mxu1 %v2611_v0  ;;  %2259 = vmatpush3.msra.mxu0 %v650_v36  ;;  %v3061_v31 = vsub.f32 %v1199_v24, %v3058_v28  ;;  %v1196_v36 = vld [vmem:[#allocation5 + $0x60] sm:$0xff] }
 0x12a   :  { %2302 = vmatpush3.msra.mxu1 %v2713_v38  ;;  %2260 = vmatprep.subr.mxu0 %v2611_v0  ;;  %v3066_v38 = vand.u32 4294901760, %v1197_v33 }
 0x12b   :  { %2303 = vmatprep.subr.mxu1 %v2611_v0  ;;  %2261 = vmatpush3.msra.mxu0 %v657_v40  ;;  %v3068_v40 = vand.u32 4294901760, %v1196_v36 }
 0x12c   :  { %2304 = vmatpush3.msra.mxu1 %v2725_v42  ;;  %2262 = vmatprep.subr.mxu0 %v2611_v0  ;;  %v1194_v42 = vld [vmem:[#allocation5 + $0x50] sm:$0xff] }
 0x12d   :  { %2305 = vmatprep.subr.mxu1 %v2611_v0  ;;  %2263 = vmatpush3.msra.mxu0 %v664_v45  ;;  %v1193_v45 = vld [vmem:[#allocation5 + $0x48] sm:$0xff]  ;;  %v3086_v3 = vsub.f32 %v1196_v36, %v3068_v40 }
 0x12e   :  { %2306 = vmatpush3.msra.mxu1 %v2792_v1  ;;  %2264 = vmatprep.subr.mxu0 %v2611_v0  ;;  %v3083_v1 = vsub.f32 %v1197_v33, %v3066_v38 }
 0x12f   :  { %2307 = vmatprep.subr.mxu1 %v2611_v0  ;;  %2265 = vmatpush3.msra.mxu0 %v671_v49  ;;  %v1301_v49 = vand.u32 4294901760, %v3061_v31 }
 0x130   :  { %2308 = vmatpush3.msra.mxu1 %v2797_v4  ;;  %2266 = vmatprep.subr.mxu0 %v2611_v0  ;;  %v3089_v4 = vsub.f32 %v1195_v37, %v3070_v41 }
 0x131   :  { %2309 = vmatprep.subr.mxu1 %v2611_v0  ;;  %2267 = vmatpush3.msra.mxu0 %v678_v53  ;;  %v3078_v53 = vand.u32 4294901760, %v1194_v42  ;;  %v1302_v7 = vsub.f32 %v3061_v31, %v1301_v49 }
 0x132   :  { %2310 = vmatpush3.msra.mxu1 %v2805_v8  ;;  %2268 = vmatprep.subr.mxu0 %v2611_v0  ;;  %v1308_v8 = vand.u32 4294901760, %v3075_v50  ;;  %v1329_v25 = vand.u32 4294901760, %v3089_v4 }
 0x133   :  { %2311 = vmatprep.subr.mxu1 %v2611_v0  ;;  %2269 = vmatpush3.msra.mxu0 %v685_v56  ;;  %v3080_v56 = vand.u32 4294901760, %v1193_v45 }
 0x134   :  { %2312 = vmatpush3.msra.mxu1 %v2816_v15  ;;  %2270 = vmatprep.subr.mxu0 %v2611_v0  ;;  %v1315_v15 = vand.u32 4294901760, %v3083_v1 }
 0x135   :  { %2313 = vmatprep.subr.mxu1 %v2611_v0  ;;  %2271 = vmatpush3.msra.mxu0 %v692_v6  ;;  %v3092_v6 = vand.u32 4294901760, %v1192_v46  ;;  %v3103_v14 = vsub.f32 %v1193_v45, %v3080_v56 }
 0x136   :  { %2314 = vmatpush3.msra.mxu1 %v2828_v26  ;;  %2272 = vmatprep.subr.mxu0 %v2611_v0  ;;  %v1303_v26 = vand.u32 4294901760, %v1302_v7 }
 0x137   :  { %2315 = vmatprep.subr.mxu1 %v2611_v0  ;;  %2273 = vmatpush3.msra.mxu0 %v699_v12  ;;  %v3099_v12 = vsub.f32 %v1194_v42, %v3078_v53  ;;  %v3115_v51 = vsub.f32 %v1192_v46, %v3092_v6  ;;  %v1343_v63 = vand.u32 4294901760, %v3103_v14  ;;  %v1186_v42 = vld [vmem:[#allocation5 + $0x10] sm:$0xff] }
 0x138   :  { %2316 = vmatpush3.msra.mxu1 %v2835_v39  ;;  %2274 = vmatprep.subr.mxu0 %v2611_v0  ;;  %v1309_v39 = vsub.f32 %v3075_v50, %v1308_v8 }
 0x139   :  { %2317 = vmatprep.subr.mxu1 %v2611_v0  ;;  %2275 = vmatpush3.msra.mxu0 %v3438_v9  ;;  %v1336_v43 = vand.u32 4294901760, %v3099_v12  ;;  %v1350_v47 = vand.u32 4294901760, %v3115_v51  ;;  %v1344_v55 = vsub.f32 %v3103_v14, %v1343_v63  ;;  %v1188_v9 = vld [vmem:[#allocation5 + $0x20] sm:$0xff] }
 0x13a   :  { %2318 = vmatpush3.msra.mxu1 %v2848_v52  ;;  %2276 = vmatprep.subr.mxu0 %v2611_v0  ;;  %v1316_v52 = vsub.f32 %v3083_v1, %v1315_v15  ;;  %v1310_v59 = vand.u32 4294901760, %v1309_v39 }
 0x13b   :  { %2319 = vmatprep.subr.mxu1 %v2611_v0  ;;  %2277 = vmatpush3.msra.mxu0 %v3439_v13  ;;  %v1337_v44 = vsub.f32 %v3099_v12, %v1336_v43  ;;  %v1351_v62 = vsub.f32 %v3115_v51, %v1350_v47  ;;  %v1345_v11 = vand.u32 4294901760, %v1344_v55  ;;  %v1358_v13 = vsub.f32 %v3153_v19, %v1357_v34 }
 0x13c   :  { %2320 = vmatpush3.msra.mxu1 %v2858_v60  ;;  %2321 = vmatprep.mubr.msk.f32.mxu1 %vm2612_vm0, %v2611_v0  ;;  %v1330_v60 = vsub.f32 %v3089_v4, %v1329_v25  ;;  %v1317_v2 = vand.u32 4294901760, %v1316_v52  ;;  %v1185_v52 = vld [vmem:[#allocation5 + $0x8] sm:$0xff] }
 0x13d   :  { %2278 = vmatprep.subr.mxu0 %v2611_v0  ;;  %2322 = vmatmul.mubr.f32.vlgmr.msra.gmra.mxu1 %v2891_v21  ;;  %v1338_v61 = vand.u32 4294901760, %v1337_v44  ;;  %v1352_v30 = vand.u32 4294901760, %v1351_v62  ;;  %v1359_v24 = vand.u32 4294901760, %v1358_v13  ;;  %v1184_v44 = vld [vmem:[#allocation5] sm:$0xff] }
 0x13e   :  { %2279 = vmatpush3.msra.mxu0 %v3440_v17  ;;  %2286 = vmatprep.mubr.msk.f32.mxu0 %vm2612_vm0, %v2611_v0  ;;  %v1331_v48 = vand.u32 4294901760, %v1330_v60  ;;  %v1364_v17 = vand.u32 4294901760, %v3162_v54 }
 0x13f   :  { %2280 = vmatprep.subr.mxu0 %v2611_v0  ;;  %2359 = vmatprep.subr.mxu1 %v2611_v0 }
 0x140   :  { %2281 = vmatpush3.msra.mxu0 %v3441_v18  ;;  %2391 = vmatprep.mubr.msk.f32.mxu1 %vm2612_vm0, %v2611_v0  ;;  %v3174_v18 = vsub.f32 %v1189_v27, %v3164_v35  ;;  %v1365_v29 = vsub.f32 %v3162_v54, %v1364_v17 }
 0x141   :  { %2282 = vmatprep.subr.mxu0 %v2611_v0  ;;  %2360 = vmatpush3.msra.mxu1 %v1303_v26  ;;  %v3197_v26 = vand.u32 4294901760, %v1186_v42 }
 0x142   :  { %2283 = vmatpush3.msra.mxu0 %v3442_v22  ;;  %2361 = vmatprep.subr.mxu1 %v2611_v0  ;;  %v3176_v22 = vand.u32 4294901760, %v1188_v9  ;;  %v1371_v33 = vand.u32 4294901760, %v3174_v18  ;;  %v1366_v45 = vand.u32 4294901760, %v1365_v29 }
 0x143   :  { %2284 = vmatprep.subr.mxu0 %v2611_v0  ;;  %2362 = vmatpush3.msra.mxu1 %v1310_v59  ;;  %v3208_v60 = vsub.f32 %v1186_v42, %v3197_v26 }
 0x144   :  { %2285 = vmatpush3.msra.mxu0 %v3443_v23  ;;  %2363 = vmatprep.subr.mxu1 %v2611_v0  ;;  %v1187_v23 = vld [vmem:[#allocation5 + $0x18] sm:$0xff]  ;;  %v3186_v36 = vsub.f32 %v1188_v9, %v3176_v22  ;;  %v1372_v46 = vsub.f32 %v3174_v18, %v1371_v33 }
 0x145   :  { %2287 = vmatmul.mubr.f32.vlgmr.msra.gmra.mxu0 %v2891_v21  ;;  %2324 = vmatprep.subr.mxu0 %v2611_v0  ;;  %v1322_v21 = vand.u32 4294901760, %v3086_v3  ;;  %v3190_v37 = vand.u32 4294901760, %v1187_v23  ;;  %v3436_v55 = vand.u32 4294901760, %v3208_v60 }
 0x146   :  { %2356 = vmatprep.mubr.msk.f32.mxu0 %vm2612_vm0, %v2611_v0  ;;  %2325 = vmatpush3.msra.mxu0 %v3058_v28  ;;  %v1378_v7 = vand.u32 4294901760, %v3186_v36 }
 0x147   :  { %2326 = vmatprep.subr.mxu0 %v2611_v0  ;;  %v1323_v58 = vsub.f32 %v3086_v3, %v1322_v21  ;;  %2364 = vmatpush3.msra.mxu1 %v1317_v2  ;;  %v3201_v39 = vsub.f32 %v1187_v23, %v3190_v37  ;;  %v3210_v2 = vand.u32 4294901760, %v1185_v52  ;;  %v1393_v10 = vsub.f32 %v3208_v60, %v3436_v55 }
 0x148   :  { %2327 = vmatpush3.msra.mxu0 %v3063_v32  ;;  %2365 = vmatprep.subr.mxu1 %v2611_v0  ;;  %v1379_v59 = vsub.f32 %v3186_v36, %v1378_v7 }
 0x149   :  { %2328 = vmatprep.subr.mxu0 %v2611_v0  ;;  %v1324_v16 = vand.u32 4294901760, %v1323_v58  ;;  %v1373_v58 = vand.u32 4294901760, %v1372_v46  ;;  %v3218_v57 = vsub.f32 %v1185_v52, %v3210_v2  ;;  %v1394_v9 = vand.u32 4294901760, %v1393_v10  ;;  %v1866_v10 = vld [vmem:[%s3424_s4] ss:$0 sm:$0xff] }
 0x14a   :  { %2329 = vmatpush3.msra.mxu0 %v3066_v38 }
 0x14b   :  { %2330 = vmatprep.subr.mxu0 %v2611_v0  ;;  %2366 = vmatpush3.msra.mxu1 %v1324_v16  ;;  %v3437_v16 = vand.u32 4294901760, %v3201_v39 }
 0x14c   :  { %2331 = vmatpush3.msra.mxu0 %v3068_v40  ;;  %2367 = vmatprep.subr.mxu1 %v2611_v0 }
 0x14d   :  { %2332 = vmatprep.subr.mxu0 %v2611_v0  ;;  %2368 = vmatpush3.msra.mxu1 %v1331_v48  ;;  %v1380_v48 = vand.u32 4294901760, %v1379_v59  ;;  %v1386_v62 = vsub.f32 %v3201_v39, %v3437_v16 }
 0x14e   :  { %2333 = vmatpush3.msra.mxu0 %v3070_v41  ;;  %2369 = vmatprep.subr.mxu1 %v2611_v0 }
 0x14f   :  { %2334 = vmatprep.subr.mxu0 %v2611_v0  ;;  %2370 = vmatpush3.msra.mxu1 %v1338_v61  ;;  %v3220_v61 = vand.u32 4294901760, %v1184_v44 }
 0x150   :  { %2335 = vmatpush3.msra.mxu0 %v3078_v53  ;;  %2371 = vmatprep.subr.mxu1 %v2611_v0 }
 0x151   :  { %2336 = vmatprep.subr.mxu0 %v2611_v0  ;;  %2372 = vmatpush3.msra.mxu1 %v1345_v11  ;;  %v3435_v11 = vand.u32 4294901760, %v3218_v57  ;;  %v3233_v27 = vsub.f32 %v1184_v44, %v3220_v61 }
 0x152   :  { %2337 = vmatpush3.msra.mxu0 %v3080_v56  ;;  %2373 = vmatprep.subr.mxu1 %v2611_v0 }
 0x153   :  { %2338 = vmatprep.subr.mxu0 %v2611_v0  ;;  %2374 = vmatpush3.msra.mxu1 %v1352_v30  ;;  %v1387_v30 = vand.u32 4294901760, %v1386_v62  ;;  %v1400_v13 = vsub.f32 %v3218_v57, %v3435_v11  ;;  %v3434_v23 = vand.u32 4294901760, %v3233_v27 }
 0x154   :  { %2339 = vmatpush3.msra.mxu0 %v3092_v6  ;;  %2375 = vmatprep.subr.mxu1 %v2611_v0 }
 0x155   :  { %2340 = vmatprep.subr.mxu0 %v2611_v0  ;;  %2376 = vmatpush3.msra.mxu1 %v1359_v24  ;;  %v1401_v24 = vand.u32 4294901760, %v1400_v13  ;;  %v1407_v29 = vsub.f32 %v3233_v27, %v3434_v23 }
 0x156   :  { %2341 = vmatpush3.msra.mxu0 %v3147_v5  ;;  %2377 = vmatprep.subr.mxu1 %v2611_v0 }
 0x157   :  { %2342 = vmatprep.subr.mxu0 %v2611_v0  ;;  %2378 = vmatpush3.msra.mxu1 %v1366_v45  ;;  %v1408_v42 = vand.u32 4294901760, %v1407_v29 }
 0x158   :  { %2343 = vmatpush3.msra.mxu0 %v3155_v20  ;;  %2379 = vmatprep.subr.mxu1 %v2611_v0 }
 0x159   :  { %2344 = vmatprep.subr.mxu0 %v2611_v0  ;;  %2380 = vmatpush3.msra.mxu1 %v1373_v58 }
 0x15a   :  { %2345 = vmatpush3.msra.mxu0 %v3164_v35  ;;  %2381 = vmatprep.subr.mxu1 %v2611_v0 }
 0x15b   :  { %2346 = vmatprep.subr.mxu0 %v2611_v0  ;;  %2382 = vmatpush3.msra.mxu1 %v1380_v48 }
 0x15c   :  { %2347 = vmatpush3.msra.mxu0 %v3176_v22  ;;  %2383 = vmatprep.subr.mxu1 %v2611_v0 }
 0x15d   :  { %2348 = vmatprep.subr.mxu0 %v2611_v0  ;;  %2384 = vmatpush3.msra.mxu1 %v1387_v30 }
 0x15e   :  { %2349 = vmatpush3.msra.mxu0 %v3190_v37  ;;  %2385 = vmatprep.subr.mxu1 %v2611_v0 }
 0x15f   :  { %2350 = vmatprep.subr.mxu0 %v2611_v0  ;;  %2386 = vmatpush3.msra.mxu1 %v1394_v9 }
 0x160   :  { %2351 = vmatpush3.msra.mxu0 %v3197_v26  ;;  %2387 = vmatprep.subr.mxu1 %v2611_v0 }
 0x161   :  { %2352 = vmatprep.subr.mxu0 %v2611_v0  ;;  %2388 = vmatpush3.msra.mxu1 %v1401_v24 }
 0x162   :  { %2353 = vmatpush3.msra.mxu0 %v3210_v2  ;;  %2389 = vmatprep.subr.mxu1 %v2611_v0 }
 0x163   :  { %2354 = vmatprep.subr.mxu0 %v2611_v0  ;;  %2390 = vmatpush3.msra.mxu1 %v1408_v42 }
 0x164   :  { %2355 = vmatpush3.msra.mxu0 %v3220_v61  ;;  %2429 = vmatprep.subr.mxu1 %v2611_v0 }
 0x165   :  { %2394 = vmatprep.subr.mxu0 %v2611_v0 }
 0x1bb   :  { %v780_v45 = vpop.f32.mrf.mxu1 }
 0x1bd   :  { %v2183_v46 = vpop.f32.mrf.mxu1 }
 0x1c3   :  { %v629_v52 = vpop.f32.mrf.mxu0 }
 0x1c4   :  { %v630_v30 = vadd.f32 %v1866_v10, %v629_v52 }
 0x1c5   :  { %v2148_v58 = vpop.f32.mrf.mxu0 }
 0x1c6   :  { %v781_v13 = vadd.f32 %v780_v45, %v630_v30 }
 0x1db   :  { %v973_v59 = vpop.f32.mrf.mxu1 }
 0x1dd   :  { %v2253_v44 = vpop.f32.mrf.mxu1 }
 0x1e4   :  { %v884_v48 = vpop.f32.mrf.mxu0 }
 0x1e5   :  { %v885_v29 = vadd.f32 %v884_v48, %v781_v13 }
 0x1e6   :  { %v2218_v62 = vpop.f32.mrf.mxu0 }
 0x1e7   :  { %v974_v42 = vadd.f32 %v973_v59, %v885_v29 }
 0x1fd   :  { %v1179_v9 = vpop.f32.mrf.mxu1 }
 0x1ff   :  { %v2323_v24 = vpop.f32.mrf.mxu1 }
 0x205   :  { %v1092_v23 = vpop.f32.mrf.mxu0 }
 0x206   :  { %v1093_v11 = vadd.f32 %v1092_v23, %v974_v42 }
 0x207   :  { %v2288_v55 = vpop.f32.mrf.mxu0 }
 0x208   :  { %v1180_v46 = vadd.f32 %v1179_v9, %v1093_v11 }
 0x20a   :  { %v1183_v16 = vmax.f32 %v1180_v46, 0.0 }
 0x20c   :  { %v3253_v58 = vand.u32 4294901760, %v1183_v16 }
 0x20e   :  { %v3256_v44 = vsub.f32 %v1183_v16, %v3253_v58  ;;  %2392 = vmatmul.mubr.f32.vlgmr.msra.gmra.mxu1 %v3253_v58 }
 0x20f   :  { %2430 = vmatpush3.msra.mxu1 %v3058_v28  ;;  %2461 = vmatprep.mubr.msk.f32.mxu1 %vm2612_vm0, %v2611_v0 }
 0x210   :  { %v1290_v45 = vand.u32 4294901760, %v3256_v44  ;;  %2431 = vmatprep.subr.mxu1 %v2611_v0 }
 0x211   :  { %2432 = vmatpush3.msra.mxu1 %v3063_v32 }
 0x212   :  { %2433 = vmatprep.subr.mxu1 %v2611_v0  ;;  %v1291_v55 = vsub.f32 %v3256_v44, %v1290_v45 }
 0x213   :  { %2434 = vmatpush3.msra.mxu1 %v3066_v38 }
 0x214   :  { %2435 = vmatprep.subr.mxu1 %v2611_v0  ;;  %v1292_v16 = vand.u32 4294901760, %v1291_v55 }
 0x215   :  { %2436 = vmatpush3.msra.mxu1 %v3068_v40 }
 0x216   :  { %2437 = vmatprep.subr.mxu1 %v2611_v0  ;;  %2357 = vmatmul.mubr.f32.vlgmr.msra.gmra.mxu0 %v1292_v16 }
 0x217   :  { %2395 = vmatpush3.msra.mxu0 %v3061_v31  ;;  %2438 = vmatpush3.msra.mxu1 %v3070_v41  ;;  %v3445_v31 = vand.u32 4294901760, %v3208_v60 }
 0x218   :  { %2396 = vmatprep.subr.mxu0 %v2611_v0  ;;  %2439 = vmatprep.subr.mxu1 %v2611_v0 }
 0x219   :  { %2397 = vmatpush3.msra.mxu0 %v3075_v50  ;;  %2440 = vmatpush3.msra.mxu1 %v3078_v53 }
 0x21a   :  { %2398 = vmatprep.subr.mxu0 %v2611_v0  ;;  %2441 = vmatprep.subr.mxu1 %v2611_v0 }
 0x21b   :  { %2399 = vmatpush3.msra.mxu0 %v3083_v1  ;;  %2442 = vmatpush3.msra.mxu1 %v3080_v56 }
 0x21c   :  { %2400 = vmatprep.subr.mxu0 %v2611_v0  ;;  %2443 = vmatprep.subr.mxu1 %v2611_v0 }
 0x21d   :  { %2401 = vmatpush3.msra.mxu0 %v3086_v3  ;;  %2444 = vmatpush3.msra.mxu1 %v3092_v6 }
 0x21e   :  { %2402 = vmatprep.subr.mxu0 %v2611_v0  ;;  %2445 = vmatprep.subr.mxu1 %v2611_v0 }
 0x21f   :  { %2403 = vmatpush3.msra.mxu0 %v3089_v4  ;;  %2446 = vmatpush3.msra.mxu1 %v3147_v5  ;;  %v1867_v4 = vld [vmem:[%s3426_s6] ss:$0 sm:$0xff] }
 0x220   :  { %2404 = vmatprep.subr.mxu0 %v2611_v0  ;;  %2447 = vmatprep.subr.mxu1 %v2611_v0 }
 0x221   :  { %2405 = vmatpush3.msra.mxu0 %v3099_v12  ;;  %2448 = vmatpush3.msra.mxu1 %v3155_v20 }
 0x222   :  { %2406 = vmatprep.subr.mxu0 %v2611_v0  ;;  %2449 = vmatprep.subr.mxu1 %v2611_v0 }
 0x223   :  { %2407 = vmatpush3.msra.mxu0 %v3103_v14  ;;  %2450 = vmatpush3.msra.mxu1 %v3164_v35 }
 0x224   :  { %2408 = vmatprep.subr.mxu0 %v2611_v0  ;;  %2451 = vmatprep.subr.mxu1 %v2611_v0 }
 0x225   :  { %2409 = vmatpush3.msra.mxu0 %v3115_v51  ;;  %2452 = vmatpush3.msra.mxu1 %v3176_v22 }
 0x226   :  { %2410 = vmatprep.subr.mxu0 %v2611_v0  ;;  %2453 = vmatprep.subr.mxu1 %v2611_v0 }
 0x227   :  { %2411 = vmatpush3.msra.mxu0 %v3153_v19  ;;  %2454 = vmatpush3.msra.mxu1 %v3190_v37 }
 0x228   :  { %2412 = vmatprep.subr.mxu0 %v2611_v0  ;;  %2455 = vmatprep.subr.mxu1 %v2611_v0 }
 0x229   :  { %2413 = vmatpush3.msra.mxu0 %v3162_v54  ;;  %2456 = vmatpush3.msra.mxu1 %v3197_v26 }
 0x22a   :  { %2414 = vmatprep.subr.mxu0 %v2611_v0  ;;  %2457 = vmatprep.subr.mxu1 %v2611_v0 }
 0x22b   :  { %2415 = vmatpush3.msra.mxu0 %v3174_v18  ;;  %2458 = vmatpush3.msra.mxu1 %v3210_v2 }
 0x22c   :  { %2416 = vmatprep.subr.mxu0 %v2611_v0  ;;  %2459 = vmatprep.subr.mxu1 %v2611_v0 }
 0x22d   :  { %2417 = vmatpush3.msra.mxu0 %v3186_v36  ;;  %2460 = vmatpush3.msra.mxu1 %v3220_v61 }
 0x22e   :  { %2418 = vmatprep.subr.mxu0 %v2611_v0  ;;  %2462 = vmatmul.mubr.f32.vlgmr.msra.gmra.mxu1 %v1290_v45 }
 0x22f   :  { %2499 = vmatprep.subr.mxu1 %v2611_v0  ;;  %2419 = vmatpush3.msra.mxu0 %v3201_v39 }
 0x230   :  { %2500 = vmatpush3.msra.mxu1 %v3058_v28  ;;  %2420 = vmatprep.subr.mxu0 %v2611_v0  ;;  %v3444_v28 = vand.u32 4294901760, %v3201_v39 }
 0x231   :  { %2501 = vmatprep.subr.mxu1 %v2611_v0  ;;  %2421 = vmatpush3.msra.mxu0 %v3208_v60 }
 0x232   :  { %2502 = vmatpush3.msra.mxu1 %v3063_v32  ;;  %2422 = vmatprep.subr.mxu0 %v2611_v0  ;;  %v3446_v32 = vand.u32 4294901760, %v3218_v57 }
 0x233   :  { %2503 = vmatprep.subr.mxu1 %v2611_v0  ;;  %2423 = vmatpush3.msra.mxu0 %v3218_v57 }
 0x234   :  { %2504 = vmatpush3.msra.mxu1 %v3066_v38  ;;  %2424 = vmatprep.subr.mxu0 %v2611_v0  ;;  %v3447_v38 = vand.u32 4294901760, %v3233_v27 }
 0x235   :  { %2505 = vmatprep.subr.mxu1 %v2611_v0  ;;  %2425 = vmatpush3.msra.mxu0 %v3233_v27 }
 0x236   :  { %2426 = vmatprep.mubr.msk.f32.mxu0 %vm2612_vm0, %v2611_v0  ;;  %2506 = vmatpush3.msra.mxu1 %v3068_v40 }
 0x237   :  { %2427 = vmatmul.mubr.f32.vlgmr.msra.gmra.mxu0 %v3256_v44  ;;  %2464 = vmatprep.subr.mxu0 %v2611_v0 }
 0x238   :  { %2507 = vmatprep.subr.mxu1 %v2611_v0  ;;  %2465 = vmatpush3.msra.mxu0 %v1301_v49 }
 0x239   :  { %2508 = vmatpush3.msra.mxu1 %v3070_v41  ;;  %2466 = vmatprep.subr.mxu0 %v2611_v0 }
 0x23a   :  { %2509 = vmatprep.subr.mxu1 %v2611_v0  ;;  %2467 = vmatpush3.msra.mxu0 %v1308_v8 }
 0x23b   :  { %2510 = vmatpush3.msra.mxu1 %v3078_v53  ;;  %2468 = vmatprep.subr.mxu0 %v2611_v0 }
 0x23c   :  { %2511 = vmatprep.subr.mxu1 %v2611_v0  ;;  %2469 = vmatpush3.msra.mxu0 %v1315_v15 }
 0x23d   :  { %2512 = vmatpush3.msra.mxu1 %v3080_v56  ;;  %2470 = vmatprep.subr.mxu0 %v2611_v0 }
 0x23e   :  { %2513 = vmatprep.subr.mxu1 %v2611_v0  ;;  %2471 = vmatpush3.msra.mxu0 %v1322_v21 }
 0x23f   :  { %2514 = vmatpush3.msra.mxu1 %v3092_v6  ;;  %2472 = vmatprep.subr.mxu0 %v2611_v0 }
 0x240   :  { %2515 = vmatprep.subr.mxu1 %v2611_v0  ;;  %2473 = vmatpush3.msra.mxu0 %v1329_v25 }
 0x241   :  { %2516 = vmatpush3.msra.mxu1 %v3147_v5  ;;  %2474 = vmatprep.subr.mxu0 %v2611_v0 }
 0x242   :  { %2517 = vmatprep.subr.mxu1 %v2611_v0  ;;  %2475 = vmatpush3.msra.mxu0 %v1336_v43 }
 0x243   :  { %2518 = vmatpush3.msra.mxu1 %v3155_v20  ;;  %2476 = vmatprep.subr.mxu0 %v2611_v0 }
 0x244   :  { %2519 = vmatprep.subr.mxu1 %v2611_v0  ;;  %2477 = vmatpush3.msra.mxu0 %v1343_v63 }
 0x245   :  { %2520 = vmatpush3.msra.mxu1 %v3164_v35  ;;  %2478 = vmatprep.subr.mxu0 %v2611_v0 }
 0x246   :  { %2521 = vmatprep.subr.mxu1 %v2611_v0  ;;  %2479 = vmatpush3.msra.mxu0 %v1350_v47 }
 0x247   :  { %2522 = vmatpush3.msra.mxu1 %v3176_v22  ;;  %2480 = vmatprep.subr.mxu0 %v2611_v0 }
 0x248   :  { %2523 = vmatprep.subr.mxu1 %v2611_v0  ;;  %2481 = vmatpush3.msra.mxu0 %v1357_v34 }
 0x249   :  { %2524 = vmatpush3.msra.mxu1 %v3190_v37  ;;  %2482 = vmatprep.subr.mxu0 %v2611_v0 }
 0x24a   :  { %2525 = vmatprep.subr.mxu1 %v2611_v0  ;;  %2483 = vmatpush3.msra.mxu0 %v1364_v17 }
 0x24b   :  { %2526 = vmatpush3.msra.mxu1 %v3197_v26  ;;  %2484 = vmatprep.subr.mxu0 %v2611_v0 }
 0x24c   :  { %2527 = vmatprep.subr.mxu1 %v2611_v0  ;;  %2485 = vmatpush3.msra.mxu0 %v1371_v33 }
 0x24d   :  { %2528 = vmatpush3.msra.mxu1 %v3210_v2  ;;  %2486 = vmatprep.subr.mxu0 %v2611_v0 }
 0x24e   :  { %2529 = vmatprep.subr.mxu1 %v2611_v0  ;;  %2487 = vmatpush3.msra.mxu0 %v1378_v7 }
 0x24f   :  { %2530 = vmatpush3.msra.mxu1 %v3220_v61  ;;  %2531 = vmatprep.mubr.msk.f32.mxu1 %vm2612_vm0, %v2611_v0 }
 0x250   :  { %2488 = vmatprep.subr.mxu0 %v2611_v0  ;;  %2532 = vmatmul.mubr.f32.vlgmr.msra.gmra.mxu1 %v3253_v58 }
 0x251   :  { %2489 = vmatpush3.msra.mxu0 %v3444_v28  ;;  %2496 = vmatprep.mubr.msk.f32.mxu0 %vm2612_vm0, %v2611_v0 }
 0x252   :  { %2490 = vmatprep.subr.mxu0 %v2611_v0 }
 0x253   :  { %2491 = vmatpush3.msra.mxu0 %v3445_v31 }
 0x254   :  { %2492 = vmatprep.subr.mxu0 %v2611_v0 }
 0x255   :  { %2493 = vmatpush3.msra.mxu0 %v3446_v32 }
 0x256   :  { %2494 = vmatprep.subr.mxu0 %v2611_v0 }
 0x257   :  { %2495 = vmatpush3.msra.mxu0 %v3447_v38 }
 0x258   :  { %2497 = vmatmul.mubr.f32.vlgmr.msra.gmra.mxu0 %v3253_v58 }
 0x2ce   :  { %v1445_v40 = vpop.f32.mrf.mxu1 }
 0x2d0   :  { %v2393_v41 = vpop.f32.mrf.mxu1 }
 0x2d6   :  { %v1294_v49 = vpop.f32.mrf.mxu0 }
 0x2d7   :  { %v1295_v6 = vadd.f32 %v1867_v4, %v1294_v49 }
 0x2d8   :  { %v2358_v50 = vpop.f32.mrf.mxu0 }
 0x2d9   :  { %v1446_v0 = vadd.f32 %v1445_v40, %v1295_v6 }
 0x2ee   :  { %v1638_v53 = vpop.f32.mrf.mxu1 }
 0x2f0   :  { %v2463_v56 = vpop.f32.mrf.mxu1 }
 0x2f7   :  { %v1549_v1 = vpop.f32.mrf.mxu0 }
 0x2f8   :  { %v1550_v14 = vadd.f32 %v1549_v1, %v1446_v0 }
 0x2f9   :  { %v2428_v3 = vpop.f32.mrf.mxu0 }
 0x2fa   :  { %v1639_v15 = vadd.f32 %v1638_v53, %v1550_v14 }
 0x310   :  { %v1844_v8 = vpop.f32.mrf.mxu1 }
 0x312   :  { %v2533_v12 = vpop.f32.mrf.mxu1 }
 0x318   :  { %v1757_v21 = vpop.f32.mrf.mxu0 }
 0x319   :  { %v1758_v25 = vadd.f32 %v1757_v21, %v1639_v15 }
 0x31a   :  { %v2498_v43 = vpop.f32.mrf.mxu0 }
 0x31b   :  { %v1845_v51 = vadd.f32 %v1844_v8, %v1758_v25 }
 0x31d   :  { %1848 = vst [vmem:[#allocation7] sm:$0xff] %v1845_v51 }
 0x31e   :  { %2592 = shalt.err (!%p2589_p0)
}
 0x31f   :  { %1858 = dma.vmem_to_hbm [thread:$0]  %s1856_s18, 128, %s3427_s7, [#allocation4]  }
 0x320   :  { %2605 = dma.done.wait [#allocation4], 128  }
 0x321   :  { %2606 = vsyncadd [#allocation4], 4294967168 }
 0x322   :  { %1862 = vsyncpa [#allocation3], 1 }
 0x323   :  { %1863 = vsyncpa [#allocation6], 1 }
 0x324   :  { %1864 = vsyncpa [#allocation4], 1 }

</bundles_post_ra>
